<compile_context>
chip_gen: v5e
topology: v5e:2x2
jax: 0.10.0
libtpu: 0.0.40
codegen_flags: <defaults>
</compile_context>

<pallas_src>
import jax
import jax.numpy as jnp
from jax import lax
from jax.experimental import pallas as pl
from jax.experimental.pallas import tpu as pltpu


def _round_up(x, m):
    return ((x + m - 1) // m) * m


def _layernorm(x, gamma, beta, eps=1e-5):
    mu = jnp.mean(x, axis=-1, keepdims=True)
    xc = x - mu
    var = jnp.mean(xc * xc, axis=-1, keepdims=True)
    return xc * lax.rsqrt(var + eps) * gamma + beta


def q_critic_kernel(s_ref, a_ref,
                    w1s_ref, w1a_ref, b1_ref, g1_ref, be1_ref,
                    w2_ref, b2_ref, g2_ref, be2_ref,
                    w3_ref, b3_ref, g3_ref, be3_ref,
                    w4_ref, b4_ref,
                    out_ref):
    # layer 1: Linear (split over state/action halves of W1) -> LayerNorm -> ReLU
    h = (jnp.dot(s_ref[...], w1s_ref[...], preferred_element_type=jnp.float32)
         + jnp.dot(a_ref[...], w1a_ref[...], preferred_element_type=jnp.float32)
         + b1_ref[...])
    h = jnp.maximum(_layernorm(h, g1_ref[...], be1_ref[...]), 0.0)

    # layer 2: Linear -> LayerNorm -> ReLU
    h = jnp.dot(h, w2_ref[...], preferred_element_type=jnp.float32) + b2_ref[...]
    h = jnp.maximum(_layernorm(h, g2_ref[...], be2_ref[...]), 0.0)

    # layer 3: Linear -> LayerNorm -> ReLU
    h = jnp.dot(h, w3_ref[...], preferred_element_type=jnp.float32) + b3_ref[...]
    h = jnp.maximum(_layernorm(h, g3_ref[...], be3_ref[...]), 0.0)

    # layer 4: single-output-column Linear -> VPU multiply + lane reduction
    q = jnp.sum(h * w4_ref[...], axis=-1, keepdims=True) + b4_ref[...]
    out_ref[...] = q.astype(out_ref.dtype)


def q_critic_forward(state, action, params, tile_b=512):
    B, state_dim = state.shape
    action_dim = action.shape[1]
    W = params["w2"].shape[0]
    W2 = params["w3"].shape[1]

    # Batch tile: multiple of 8 sublanes, no larger than the (padded) batch.
    TB = min(tile_b, _round_up(B, 8))
    Bp = _round_up(B, TB)
    if Bp != B:
        pad = Bp - B
        state = jnp.pad(state, ((0, pad), (0, 0)))
        action = jnp.pad(action, ((0, pad), (0, 0)))
    grid = (Bp // TB,)

    # Pre-split W1 so the kernel never needs the concatenated [state, action].
    w1s = params["w1"][:state_dim]
    w1a = params["w1"][state_dim:]
    w4_row = params["w4"].reshape(1, W2)  # (1, W2) row for the VPU reduce

    inputs = (state, action,
              w1s, w1a, params["b1"], params["g1"], params["be1"],
              params["w2"], params["b2"], params["g2"], params["be2"],
              params["w3"], params["b3"], params["g3"], params["be3"],
              w4_row, params["b4"])

    def batch_spec(shape):
        return pl.BlockSpec(shape, lambda i: (i, 0))

    def resident_spec(x):
        # Full-shape block, constant block index -> DMA'd once, stays resident.
        return pl.BlockSpec(x.shape, lambda i: (0, 0))

    in_specs = [batch_spec((TB, state_dim)), batch_spec((TB, action_dim))]
    in_specs += [resident_spec(x) for x in inputs[2:]]

    flops = 2 * Bp * (state_dim * W + action_dim * W + W * W + W * W2 + W2)
    bytes_accessed = 4 * (Bp * (state_dim + action_dim + 1)
                          + sum(int(x.size) for x in inputs[2:]))
    cost = pl.CostEstimate(flops=flops,
                           transcendentals=3 * Bp,   # one rsqrt per row per LN
                           bytes_accessed=bytes_accessed)

    out = pl.pallas_call(
        q_critic_kernel,
        out_shape=jax.ShapeDtypeStruct((Bp, 1), jnp.float32),
        grid=grid,
        in_specs=in_specs,
        out_specs=batch_spec((TB, 1)),
        compiler_params=pltpu.CompilerParams(
            dimension_semantics=("parallel",)),
        cost_estimate=cost,
    )(*inputs)
    return out[:B]


def init_params(key, state_dim, action_dim, net_width):
    dims = [(state_dim + action_dim, net_width),
            (net_width, net_width),
            (net_width, net_width // 2),
            (net_width // 2, 1)]
    params = {}
    keys = jax.random.split(key, 8)
    for i, (din, dout) in enumerate(dims, start=1):
        bound = 1.0 / jnp.sqrt(din)
        params[f"w{i}"] = jax.random.uniform(
            keys[2 * (i - 1)], (din, dout), jnp.float32, -bound, bound)
        params[f"b{i}"] = jax.random.uniform(
            keys[2 * (i - 1) + 1], (1, dout), jnp.float32, -bound, bound)
    # LayerNorm affine params (PyTorch default: gamma=1, beta=0)
    params["g1"] = jnp.ones((1, net_width), jnp.float32)
    params["be1"] = jnp.zeros((1, net_width), jnp.float32)
    params["g2"] = jnp.ones((1, net_width), jnp.float32)
    params["be2"] = jnp.zeros((1, net_width), jnp.float32)
    params["g3"] = jnp.ones((1, net_width // 2), jnp.float32)
    params["be3"] = jnp.zeros((1, net_width // 2), jnp.float32)
    return params


def reference_forward(state, action, params):
    sa = jnp.concatenate([state, action], axis=1)
    h = _layernorm(sa @ params["w1"] + params["b1"], params["g1"], params["be1"])
    h = jnp.maximum(h, 0.0)
    h = _layernorm(h @ params["w2"] + params["b2"], params["g2"], params["be2"])
    h = jnp.maximum(h, 0.0)
    h = _layernorm(h @ params["w3"] + params["b3"], params["g3"], params["be3"])
    h = jnp.maximum(h, 0.0)
    return h @ params["w4"] + params["b4"]


if __name__ == "__main__":
    state_dim, action_dim, net_width = 8, 4, 32
    batch = 8

    key = jax.random.PRNGKey(0)
    k_state, k_action, k_params = jax.random.split(key, 3)
    state = jax.random.normal(k_state, (batch, state_dim), jnp.float32)
    action = jax.random.normal(k_action, (batch, action_dim), jnp.float32)
    params = init_params(k_params, state_dim, action_dim, net_width)

    q = q_critic_forward(state, action, params)
    q = jax.block_until_ready(q)

    q_ref = reference_forward(state, action, params)
    assert q.shape == (batch, 1)
    assert jnp.allclose(q, q_ref, atol=1e-4, rtol=1e-4)

    print("KERNEL_OK")
</pallas_src>

<mosaic_0001>
module attributes {stable_mosaic.version = 11 : i64} {
  func.func @q_critic_kernel(%arg0: i32, %arg1: memref<8x8xf32, #tpu.memory_space<vmem>>, %arg2: memref<8x4xf32, #tpu.memory_space<vmem>>, %arg3: memref<8x32xf32, #tpu.memory_space<vmem>>, %arg4: memref<4x32xf32, #tpu.memory_space<vmem>>, %arg5: memref<1x32xf32, #tpu.memory_space<vmem>>, %arg6: memref<1x32xf32, #tpu.memory_space<vmem>>, %arg7: memref<1x32xf32, #tpu.memory_space<vmem>>, %arg8: memref<32x32xf32, #tpu.memory_space<vmem>>, %arg9: memref<1x32xf32, #tpu.memory_space<vmem>>, %arg10: memref<1x32xf32, #tpu.memory_space<vmem>>, %arg11: memref<1x32xf32, #tpu.memory_space<vmem>>, %arg12: memref<32x16xf32, #tpu.memory_space<vmem>>, %arg13: memref<1x16xf32, #tpu.memory_space<vmem>>, %arg14: memref<1x16xf32, #tpu.memory_space<vmem>>, %arg15: memref<1x16xf32, #tpu.memory_space<vmem>>, %arg16: memref<1x16xf32, #tpu.memory_space<vmem>>, %arg17: memref<1x1xf32, #tpu.memory_space<vmem>>, %arg18: memref<8x1xf32, #tpu.memory_space<vmem>>) attributes {dimension_semantics = [#tpu.dimension_semantics<parallel>], iteration_bounds = array<i64: 1>, scalar_prefetch = 0 : i64, scratch_operands = 0 : i64, tpu.core_type = #tpu.core_type<tc>, window_params = [{transform_indices = @transform_0, window_bounds = array<i64: 8, 8>}, {transform_indices = @transform_1, window_bounds = array<i64: 8, 4>}, {pipeline_mode = #tpu.pipeline_mode<synchronous>, transform_indices = @transform_2, window_bounds = array<i64: 8, 32>}, {pipeline_mode = #tpu.pipeline_mode<synchronous>, transform_indices = @transform_3, window_bounds = array<i64: 4, 32>}, {pipeline_mode = #tpu.pipeline_mode<synchronous>, transform_indices = @transform_4, window_bounds = array<i64: 1, 32>}, {pipeline_mode = #tpu.pipeline_mode<synchronous>, transform_indices = @transform_5, window_bounds = array<i64: 1, 32>}, {pipeline_mode = #tpu.pipeline_mode<synchronous>, transform_indices = @transform_6, window_bounds = array<i64: 1, 32>}, {pipeline_mode = #tpu.pipeline_mode<synchronous>, transform_indices = @transform_7, window_bounds = array<i64: 32, 32>}, {pipeline_mode = #tpu.pipeline_mode<synchronous>, transform_indices = @transform_8, window_bounds = array<i64: 1, 32>}, {pipeline_mode = #tpu.pipeline_mode<synchronous>, transform_indices = @transform_9, window_bounds = array<i64: 1, 32>}, {pipeline_mode = #tpu.pipeline_mode<synchronous>, transform_indices = @transform_10, window_bounds = array<i64: 1, 32>}, {pipeline_mode = #tpu.pipeline_mode<synchronous>, transform_indices = @transform_11, window_bounds = array<i64: 32, 16>}, {pipeline_mode = #tpu.pipeline_mode<synchronous>, transform_indices = @transform_12, window_bounds = array<i64: 1, 16>}, {pipeline_mode = #tpu.pipeline_mode<synchronous>, transform_indices = @transform_13, window_bounds = array<i64: 1, 16>}, {pipeline_mode = #tpu.pipeline_mode<synchronous>, transform_indices = @transform_14, window_bounds = array<i64: 1, 16>}, {pipeline_mode = #tpu.pipeline_mode<synchronous>, transform_indices = @transform_15, window_bounds = array<i64: 1, 16>}, {pipeline_mode = #tpu.pipeline_mode<synchronous>, transform_indices = @transform_16, window_bounds = array<i64: 1, 1>}, {transform_indices = @transform_17, window_bounds = array<i64: 8, 1>}]} {
    %c0 = arith.constant 0 : index
    %c0_0 = arith.constant 0 : index
    %0 = vector.load %arg1[%c0, %c0_0] : memref<8x8xf32, #tpu.memory_space<vmem>>, vector<8x8xf32>
    %c0_1 = arith.constant 0 : index
    %c0_2 = arith.constant 0 : index
    %1 = vector.load %arg3[%c0_1, %c0_2] : memref<8x32xf32, #tpu.memory_space<vmem>>, vector<8x32xf32>
    %cst = arith.constant dense<0.000000e+00> : vector<8x32xf32>
    %2 = tpu.matmul %0, %1, %cst {dimension_numbers = #tpu.dot_dimension_numbers<[1], [0], [0], [1], [0, 0, 1, 1], [], []>} : vector<8x8xf32>, vector<8x32xf32>, vector<8x32xf32> -> vector<8x32xf32>
    %c0_3 = arith.constant 0 : index
    %c0_4 = arith.constant 0 : index
    %3 = vector.load %arg2[%c0_3, %c0_4] : memref<8x4xf32, #tpu.memory_space<vmem>>, vector<8x4xf32>
    %c0_5 = arith.constant 0 : index
    %c0_6 = arith.constant 0 : index
    %4 = vector.load %arg4[%c0_5, %c0_6] : memref<4x32xf32, #tpu.memory_space<vmem>>, vector<4x32xf32>
    %cst_7 = arith.constant dense<0.000000e+00> : vector<8x32xf32>
    %5 = tpu.matmul %3, %4, %cst_7 {dimension_numbers = #tpu.dot_dimension_numbers<[1], [0], [0], [1], [0, 0, 1, 1], [], []>} : vector<8x4xf32>, vector<4x32xf32>, vector<8x32xf32> -> vector<8x32xf32>
    %6 = arith.addf %2, %5 : vector<8x32xf32>
    %c0_8 = arith.constant 0 : index
    %c0_9 = arith.constant 0 : index
    %7 = vector.load %arg5[%c0_8, %c0_9] : memref<1x32xf32, #tpu.memory_space<vmem>>, vector<1x32xf32>
    %8 = vector.broadcast %7 : vector<1x32xf32> to vector<8x32xf32>
    %9 = arith.addf %6, %8 : vector<8x32xf32>
    %c0_10 = arith.constant 0 : index
    %c0_11 = arith.constant 0 : index
    %10 = vector.load %arg6[%c0_10, %c0_11] : memref<1x32xf32, #tpu.memory_space<vmem>>, vector<1x32xf32>
    %c0_12 = arith.constant 0 : index
    %c0_13 = arith.constant 0 : index
    %11 = vector.load %arg7[%c0_12, %c0_13] : memref<1x32xf32, #tpu.memory_space<vmem>>, vector<1x32xf32>
    %cst_14 = arith.constant dense<0.000000e+00> : vector<8xf32>
    %12 = vector.multi_reduction <add>, %9, %cst_14 [1] : vector<8x32xf32> to vector<8xf32>
    %13 = vector.shape_cast %12 : vector<8xf32> to vector<8x1xf32>
    %cst_15 = arith.constant 3.200000e+01 : f32
    %14 = vector.broadcast %cst_15 : f32 to vector<8x1xf32>
    %15 = arith.divf %13, %14 : vector<8x1xf32>
    %16 = vector.broadcast %15 : vector<8x1xf32> to vector<8x32xf32>
    %17 = arith.subf %9, %16 : vector<8x32xf32>
    %18 = arith.mulf %17, %17 : vector<8x32xf32>
    %cst_16 = arith.constant dense<0.000000e+00> : vector<8xf32>
    %19 = vector.multi_reduction <add>, %18, %cst_16 [1] : vector<8x32xf32> to vector<8xf32>
    %20 = vector.shape_cast %19 : vector<8xf32> to vector<8x1xf32>
    %cst_17 = arith.constant 3.200000e+01 : f32
    %21 = vector.broadcast %cst_17 : f32 to vector<8x1xf32>
    %22 = arith.divf %20, %21 : vector<8x1xf32>
    %cst_18 = arith.constant 9.99999974E-6 : f32
    %23 = vector.broadcast %cst_18 : f32 to vector<8x1xf32>
    %24 = arith.addf %22, %23 : vector<8x1xf32>
    %25 = math.rsqrt %24 : vector<8x1xf32>
    %26 = vector.broadcast %25 : vector<8x1xf32> to vector<8x32xf32>
    %27 = arith.mulf %17, %26 : vector<8x32xf32>
    %28 = vector.broadcast %10 : vector<1x32xf32> to vector<8x32xf32>
    %29 = arith.mulf %27, %28 : vector<8x32xf32>
    %30 = vector.broadcast %11 : vector<1x32xf32> to vector<8x32xf32>
    %31 = arith.addf %29, %30 : vector<8x32xf32>
    %cst_19 = arith.constant 0.000000e+00 : f32
    %32 = vector.broadcast %cst_19 : f32 to vector<8x32xf32>
    %33 = arith.maximumf %31, %32 : vector<8x32xf32>
    %c0_20 = arith.constant 0 : index
    %c0_21 = arith.constant 0 : index
    %34 = vector.load %arg8[%c0_20, %c0_21] : memref<32x32xf32, #tpu.memory_space<vmem>>, vector<32x32xf32>
    %cst_22 = arith.constant dense<0.000000e+00> : vector<8x32xf32>
    %35 = tpu.matmul %33, %34, %cst_22 {dimension_numbers = #tpu.dot_dimension_numbers<[1], [0], [0], [1], [0, 0, 1, 1], [], []>} : vector<8x32xf32>, vector<32x32xf32>, vector<8x32xf32> -> vector<8x32xf32>
    %c0_23 = arith.constant 0 : index
    %c0_24 = arith.constant 0 : index
    %36 = vector.load %arg9[%c0_23, %c0_24] : memref<1x32xf32, #tpu.memory_space<vmem>>, vector<1x32xf32>
    %37 = vector.broadcast %36 : vector<1x32xf32> to vector<8x32xf32>
    %38 = arith.addf %35, %37 : vector<8x32xf32>
    %c0_25 = arith.constant 0 : index
    %c0_26 = arith.constant 0 : index
    %39 = vector.load %arg10[%c0_25, %c0_26] : memref<1x32xf32, #tpu.memory_space<vmem>>, vector<1x32xf32>
    %c0_27 = arith.constant 0 : index
    %c0_28 = arith.constant 0 : index
    %40 = vector.load %arg11[%c0_27, %c0_28] : memref<1x32xf32, #tpu.memory_space<vmem>>, vector<1x32xf32>
    %cst_29 = arith.constant dense<0.000000e+00> : vector<8xf32>
    %41 = vector.multi_reduction <add>, %38, %cst_29 [1] : vector<8x32xf32> to vector<8xf32>
    %42 = vector.shape_cast %41 : vector<8xf32> to vector<8x1xf32>
    %cst_30 = arith.constant 3.200000e+01 : f32
    %43 = vector.broadcast %cst_30 : f32 to vector<8x1xf32>
    %44 = arith.divf %42, %43 : vector<8x1xf32>
    %45 = vector.broadcast %44 : vector<8x1xf32> to vector<8x32xf32>
    %46 = arith.subf %38, %45 : vector<8x32xf32>
    %47 = arith.mulf %46, %46 : vector<8x32xf32>
    %cst_31 = arith.constant dense<0.000000e+00> : vector<8xf32>
    %48 = vector.multi_reduction <add>, %47, %cst_31 [1] : vector<8x32xf32> to vector<8xf32>
    %49 = vector.shape_cast %48 : vector<8xf32> to vector<8x1xf32>
    %cst_32 = arith.constant 3.200000e+01 : f32
    %50 = vector.broadcast %cst_32 : f32 to vector<8x1xf32>
    %51 = arith.divf %49, %50 : vector<8x1xf32>
    %cst_33 = arith.constant 9.99999974E-6 : f32
    %52 = vector.broadcast %cst_33 : f32 to vector<8x1xf32>
    %53 = arith.addf %51, %52 : vector<8x1xf32>
    %54 = math.rsqrt %53 : vector<8x1xf32>
    %55 = vector.broadcast %54 : vector<8x1xf32> to vector<8x32xf32>
    %56 = arith.mulf %46, %55 : vector<8x32xf32>
    %57 = vector.broadcast %39 : vector<1x32xf32> to vector<8x32xf32>
    %58 = arith.mulf %56, %57 : vector<8x32xf32>
    %59 = vector.broadcast %40 : vector<1x32xf32> to vector<8x32xf32>
    %60 = arith.addf %58, %59 : vector<8x32xf32>
    %cst_34 = arith.constant 0.000000e+00 : f32
    %61 = vector.broadcast %cst_34 : f32 to vector<8x32xf32>
    %62 = arith.maximumf %60, %61 : vector<8x32xf32>
    %c0_35 = arith.constant 0 : index
    %c0_36 = arith.constant 0 : index
    %63 = vector.load %arg12[%c0_35, %c0_36] : memref<32x16xf32, #tpu.memory_space<vmem>>, vector<32x16xf32>
    %cst_37 = arith.constant dense<0.000000e+00> : vector<8x16xf32>
    %64 = tpu.matmul %62, %63, %cst_37 {dimension_numbers = #tpu.dot_dimension_numbers<[1], [0], [0], [1], [0, 0, 1, 1], [], []>} : vector<8x32xf32>, vector<32x16xf32>, vector<8x16xf32> -> vector<8x16xf32>
    %c0_38 = arith.constant 0 : index
    %c0_39 = arith.constant 0 : index
    %65 = vector.load %arg13[%c0_38, %c0_39] : memref<1x16xf32, #tpu.memory_space<vmem>>, vector<1x16xf32>
    %66 = vector.broadcast %65 : vector<1x16xf32> to vector<8x16xf32>
    %67 = arith.addf %64, %66 : vector<8x16xf32>
    %c0_40 = arith.constant 0 : index
    %c0_41 = arith.constant 0 : index
    %68 = vector.load %arg14[%c0_40, %c0_41] : memref<1x16xf32, #tpu.memory_space<vmem>>, vector<1x16xf32>
    %c0_42 = arith.constant 0 : index
    %c0_43 = arith.constant 0 : index
    %69 = vector.load %arg15[%c0_42, %c0_43] : memref<1x16xf32, #tpu.memory_space<vmem>>, vector<1x16xf32>
    %cst_44 = arith.constant dense<0.000000e+00> : vector<8xf32>
    %70 = vector.multi_reduction <add>, %67, %cst_44 [1] : vector<8x16xf32> to vector<8xf32>
    %71 = vector.shape_cast %70 : vector<8xf32> to vector<8x1xf32>
    %cst_45 = arith.constant 1.600000e+01 : f32
    %72 = vector.broadcast %cst_45 : f32 to vector<8x1xf32>
    %73 = arith.divf %71, %72 : vector<8x1xf32>
    %74 = vector.broadcast %73 : vector<8x1xf32> to vector<8x16xf32>
    %75 = arith.subf %67, %74 : vector<8x16xf32>
    %76 = arith.mulf %75, %75 : vector<8x16xf32>
    %cst_46 = arith.constant dense<0.000000e+00> : vector<8xf32>
    %77 = vector.multi_reduction <add>, %76, %cst_46 [1] : vector<8x16xf32> to vector<8xf32>
    %78 = vector.shape_cast %77 : vector<8xf32> to vector<8x1xf32>
    %cst_47 = arith.constant 1.600000e+01 : f32
    %79 = vector.broadcast %cst_47 : f32 to vector<8x1xf32>
    %80 = arith.divf %78, %79 : vector<8x1xf32>
    %cst_48 = arith.constant 9.99999974E-6 : f32
    %81 = vector.broadcast %cst_48 : f32 to vector<8x1xf32>
    %82 = arith.addf %80, %81 : vector<8x1xf32>
    %83 = math.rsqrt %82 : vector<8x1xf32>
    %84 = vector.broadcast %83 : vector<8x1xf32> to vector<8x16xf32>
    %85 = arith.mulf %75, %84 : vector<8x16xf32>
    %86 = vector.broadcast %68 : vector<1x16xf32> to vector<8x16xf32>
    %87 = arith.mulf %85, %86 : vector<8x16xf32>
    %88 = vector.broadcast %69 : vector<1x16xf32> to vector<8x16xf32>
    %89 = arith.addf %87, %88 : vector<8x16xf32>
    %cst_49 = arith.constant 0.000000e+00 : f32
    %90 = vector.broadcast %cst_49 : f32 to vector<8x16xf32>
    %91 = arith.maximumf %89, %90 : vector<8x16xf32>
    %c0_50 = arith.constant 0 : index
    %c0_51 = arith.constant 0 : index
    %92 = vector.load %arg16[%c0_50, %c0_51] : memref<1x16xf32, #tpu.memory_space<vmem>>, vector<1x16xf32>
    %93 = vector.broadcast %92 : vector<1x16xf32> to vector<8x16xf32>
    %94 = arith.mulf %91, %93 : vector<8x16xf32>
    %cst_52 = arith.constant dense<0.000000e+00> : vector<8xf32>
    %95 = vector.multi_reduction <add>, %94, %cst_52 [1] : vector<8x16xf32> to vector<8xf32>
    %96 = vector.shape_cast %95 : vector<8xf32> to vector<8x1xf32>
    %c0_53 = arith.constant 0 : index
    %c0_54 = arith.constant 0 : index
    %97 = vector.load %arg17[%c0_53, %c0_54] : memref<1x1xf32, #tpu.memory_space<vmem>>, vector<1x1xf32>
    %98 = vector.broadcast %97 : vector<1x1xf32> to vector<8x1xf32>
    %99 = arith.addf %96, %98 : vector<8x1xf32>
    %c0_55 = arith.constant 0 : index
    %c0_56 = arith.constant 0 : index
    %100 = vector.load %arg18[%c0_55, %c0_56] : memref<8x1xf32, #tpu.memory_space<vmem>>, vector<8x1xf32>
    tpu.vector_store %arg18[%c0_55, %c0_56], %99 {strides = array<i32>} : memref<8x1xf32, #tpu.memory_space<vmem>>, vector<8x1xf32>,
    return
  }
  func.func @transform_0(%arg0: i32) -> (i32, i32) {
    %c0_i32 = arith.constant 0 : i32
    %c0_i32_0 = arith.constant 0 : i32
    return %arg0, %c0_i32 : i32, i32
  }
  func.func @transform_1(%arg0: i32) -> (i32, i32) {
    %c0_i32 = arith.constant 0 : i32
    %c0_i32_0 = arith.constant 0 : i32
    return %arg0, %c0_i32 : i32, i32
  }
  func.func @transform_2(%arg0: i32) -> (i32, i32) {
    %c0_i32 = arith.constant 0 : i32
    %c0_i32_0 = arith.constant 0 : i32
    %c0_i32_1 = arith.constant 0 : i32
    return %c0_i32, %c0_i32_0 : i32, i32
  }
  func.func @transform_3(%arg0: i32) -> (i32, i32) {
    %c0_i32 = arith.constant 0 : i32
    %c0_i32_0 = arith.constant 0 : i32
    %c0_i32_1 = arith.constant 0 : i32
    return %c0_i32, %c0_i32_0 : i32, i32
  }
  func.func @transform_4(%arg0: i32) -> (i32, i32) {
    %c0_i32 = arith.constant 0 : i32
    %c0_i32_0 = arith.constant 0 : i32
    %c0_i32_1 = arith.constant 0 : i32
    return %c0_i32, %c0_i32_0 : i32, i32
  }
  func.func @transform_5(%arg0: i32) -> (i32, i32) {
    %c0_i32 = arith.constant 0 : i32
    %c0_i32_0 = arith.constant 0 : i32
    %c0_i32_1 = arith.constant 0 : i32
    return %c0_i32, %c0_i32_0 : i32, i32
  }
  func.func @transform_6(%arg0: i32) -> (i32, i32) {
    %c0_i32 = arith.constant 0 : i32
    %c0_i32_0 = arith.constant 0 : i32
    %c0_i32_1 = arith.constant 0 : i32
    return %c0_i32, %c0_i32_0 : i32, i32
  }
  func.func @transform_7(%arg0: i32) -> (i32, i32) {
    %c0_i32 = arith.constant 0 : i32
    %c0_i32_0 = arith.constant 0 : i32
    %c0_i32_1 = arith.constant 0 : i32
    return %c0_i32, %c0_i32_0 : i32, i32
  }
  func.func @transform_8(%arg0: i32) -> (i32, i32) {
    %c0_i32 = arith.constant 0 : i32
    %c0_i32_0 = arith.constant 0 : i32
    %c0_i32_1 = arith.constant 0 : i32
    return %c0_i32, %c0_i32_0 : i32, i32
  }
  func.func @transform_9(%arg0: i32) -> (i32, i32) {
    %c0_i32 = arith.constant 0 : i32
    %c0_i32_0 = arith.constant 0 : i32
    %c0_i32_1 = arith.constant 0 : i32
    return %c0_i32, %c0_i32_0 : i32, i32
  }
  func.func @transform_10(%arg0: i32) -> (i32, i32) {
    %c0_i32 = arith.constant 0 : i32
    %c0_i32_0 = arith.constant 0 : i32
    %c0_i32_1 = arith.constant 0 : i32
    return %c0_i32, %c0_i32_0 : i32, i32
  }
  func.func @transform_11(%arg0: i32) -> (i32, i32) {
    %c0_i32 = arith.constant 0 : i32
    %c0_i32_0 = arith.constant 0 : i32
    %c0_i32_1 = arith.constant 0 : i32
    return %c0_i32, %c0_i32_0 : i32, i32
  }
  func.func @transform_12(%arg0: i32) -> (i32, i32) {
    %c0_i32 = arith.constant 0 : i32
    %c0_i32_0 = arith.constant 0 : i32
    %c0_i32_1 = arith.constant 0 : i32
    return %c0_i32, %c0_i32_0 : i32, i32
  }
  func.func @transform_13(%arg0: i32) -> (i32, i32) {
    %c0_i32 = arith.constant 0 : i32
    %c0_i32_0 = arith.constant 0 : i32
    %c0_i32_1 = arith.constant 0 : i32
    return %c0_i32, %c0_i32_0 : i32, i32
  }
  func.func @transform_14(%arg0: i32) -> (i32, i32) {
    %c0_i32 = arith.constant 0 : i32
    %c0_i32_0 = arith.constant 0 : i32
    %c0_i32_1 = arith.constant 0 : i32
    return %c0_i32, %c0_i32_0 : i32, i32
  }
  func.func @transform_15(%arg0: i32) -> (i32, i32) {
    %c0_i32 = arith.constant 0 : i32
    %c0_i32_0 = arith.constant 0 : i32
    %c0_i32_1 = arith.constant 0 : i32
    return %c0_i32, %c0_i32_0 : i32, i32
  }
  func.func @transform_16(%arg0: i32) -> (i32, i32) {
    %c0_i32 = arith.constant 0 : i32
    %c0_i32_0 = arith.constant 0 : i32
    %c0_i32_1 = arith.constant 0 : i32
    return %c0_i32, %c0_i32_0 : i32, i32
  }
  func.func @transform_17(%arg0: i32) -> (i32, i32) {
    %c0_i32 = arith.constant 0 : i32
    %c0_i32_0 = arith.constant 0 : i32
    return %arg0, %c0_i32 : i32, i32
  }
}

</mosaic_0001>

<bundles_post_ra>
// kernel: tpu_custom_call.1
= control target key start
LH: loop header
LB: loop body
LE: loop exit
PB: predicated region body
PF: predicated region fallthrough
CT: control target
= control target key end

     0   :  { %s602_s0 = inlined_call_operand.vmem [shape: f32[8,8], index: 0, kind: input, shape index: {}]   ;;  %s603_s1 = inlined_call_operand.vmem [shape: f32[8,4], index: 1, kind: input, shape index: {}]   ;;  %s604_s2 = inlined_call_operand.vmem [shape: f32[8,32], index: 2, kind: input, shape index: {}]   ;;  %s605_s3 = inlined_call_operand.vmem [shape: f32[4,32], index: 3, kind: input, shape index: {}]   ;;  %s606_s4 = inlined_call_operand.vmem [shape: f32[1,32], index: 4, kind: input, shape index: {}]   ;;  %s607_s5 = inlined_call_operand.vmem [shape: f32[1,32], index: 5, kind: input, shape index: {}]   ;;  %s608_s6 = inlined_call_operand.vmem [shape: f32[1,32], index: 6, kind: input, shape index: {}]   ;;  %s609_s7 = inlined_call_operand.vmem [shape: f32[32,32], index: 7, kind: input, shape index: {}]   ;;  %s610_s8 = inlined_call_operand.vmem [shape: f32[1,32], index: 8, kind: input, shape index: {}]   ;;  %s611_s9 = inlined_call_operand.hbm [shape: f32[1,32], index: 9, kind: input, shape index: {}]   ;;  %s612_s10 = inlined_call_operand.hbm [shape: f32[1,32], index: 10, kind: input, shape index: {}]   ;;  %s613_s11 = inlined_call_operand.vmem [shape: f32[32,16], index: 11, kind: input, shape index: {}]   ;;  %s614_s12 = inlined_call_operand.vmem [shape: f32[1,16], index: 12, kind: input, shape index: {}]   ;;  %s615_s13 = inlined_call_operand.vmem [shape: f32[1,16], index: 13, kind: input, shape index: {}]   ;;  %s616_s14 = inlined_call_operand.vmem [shape: f32[1,16], index: 14, kind: input, shape index: {}]   ;;  %s617_s15 = inlined_call_operand.vmem [shape: f32[1,16], index: 15, kind: input, shape index: {}]   ;;  %s618_s16 = inlined_call_operand.<no memory space> [shape: f32[1,1], index: 16, kind: input, shape index: {}]   ;;  %s619_s17 = inlined_call_operand.vmem [shape: f32[8,1], index: 17, kind: output, shape index: {}]  }
   0x1   :  { %620 = sst [smem:[#allocation9_spill]] %s602_s0  ;;  %v22_v0 = vstv %s618_s16 }
   0x2   :  { %621 = sst [smem:[#allocation10_spill]] %s603_s1  ;;  %23 = vst [vmem:[#allocation2] sm:$0x1] %v22_v0 }
   0x3   :  { %24 = vsyncpa [#allocation4], 0  ;;  %s49_s28 = sshll.u32 %s611_s9, 4  ;;  %s50_s28 = int_to_ptr.hbm [resolvable:$true] %s49_s28 }
   0x4   :  { %25 = vsyncpa [#allocation6], 0  ;;  %s427_s29 = smov [#allocation3]   ;;  %s60_s19 = sshll.u32 %s612_s10, 4  ;;  %s61_s19 = int_to_ptr.hbm [resolvable:$true] %s60_s19 }
   0x5   :  { %s51_s0 = sshll.u32 %s427_s29, 4  ;;  %s428_s1 = smov [#allocation5]   ;;  %s52_s0 = int_to_ptr.vmem [resolvable:$true] %s51_s0 }
   0x6   :  { %54 = dma.hbm_to_vmem [thread:$0]  %s50_s28, 16, %s52_s0, [#allocation4]  }
   0x7   :  { %s62_s20 = sshll.u32 %s428_s1, 4  ;;  %s63_s20 = int_to_ptr.vmem [resolvable:$true] %s62_s20 }
   0x8   :  { %65 = dma.hbm_to_vmem [thread:$0]  %s61_s19, 16, %s63_s20, [#allocation6]  }
   0x9   :  { %423 = dma.done.wait [#allocation4], 16  }
   0xa   :  { %424 = vsyncadd [#allocation4], 4294967280 }
   0xb   :  { %425 = dma.done.wait [#allocation6], 16  }
   0xc   :  { %426 = vsyncadd [#allocation6], 4294967280  ;;  %vm94_vm0 = vcmask 1043456   ;;  %vm90_vm1 = vcmask 31744   ;;  %vm118_vm2 = vcmask 64512   ;;  %v87_v2 = vld [vmem:[%s604_s2] sm:$0xff] }
   0xd   :  { %v89_v1 = vld [vmem:[%s605_s3] sm:$0xf]  ;;  %s622_s24 = sld [smem:[#allocation10_spill]]  ;;  %137 = vmatpush.msra.mxu1 %v87_v2  ;;  %vm149_vm3 = vcmask 261120   ;;  %v429_v11 = vmov 32.0   ;;  %v191_v23 = vld [vmem:[%s609_s7 + $0x18] sm:$0xff] }
   0xe   :  { %345 = vmatpush.msk.msra.mxu0 %vm94_vm0, %v89_v1  ;;  %s623_s27 = sld [smem:[#allocation9_spill]]  ;;  %v354_v5 = vld [vmem:[%s606_s4] ss:$0 sm:$0xff]  ;;  %365 = vrcp.f32 %v429_v11  ;;  %v190_v24 = vld [vmem:[%s609_s7 + $0x10] sm:$0xff]  ;;  %211 = vmatpush.msra.mxu2 %v191_v23  ;;  %v189_v25 = vld [vmem:[%s609_s7 + $0x8] sm:$0xff]  ;;  %vm285_vm11 = vcmask 130048  }
   0xf   :  { %v188_v26 = vld [vmem:[%s609_s7] sm:$0xff]  ;;  %v255_v52 = vld [vmem:[%s613_s11 + $0x18] sm:$0xff]  ;;  %v254_v53 = vld [vmem:[%s613_s11 + $0x10] sm:$0xff]  ;;  %vm337_vm0 = vcmask 7168  }
  0x10   :  { %212 = vmatpush.msra.mxu2 %v190_v24  ;;  %v355_v36 = vld [vmem:[%s607_s5] ss:$0 sm:$0xff]  ;;  %275 = vmatpush.msra.mxu3 %v255_v52  ;;  %v253_v54 = vld [vmem:[%s613_s11 + $0x8] sm:$0xff]  ;;  %v358_v1 = vld [vmem:[#allocation3] ss:$0 sm:$0xff] }
  0x11   :  { %v356_v39 = vld [vmem:[%s608_s6] ss:$0 sm:$0xff] }
  0x12   :  { %213 = vmatpush.msra.mxu2 %v189_v25  ;;  %v357_v43 = vld [vmem:[%s610_s8] ss:$0 sm:$0xff]  ;;  %276 = vmatpush.msra.mxu3 %v254_v53 }
  0x13   :  { %v88_v3 = vld [vmem:[%s622_s24] sm:$0xff] }
  0x14   :  { %v86_v4 = vld [vmem:[%s623_s27] sm:$0xff]  ;;  %346 = vmatmul.msk.f32.vlgmr.msra.gmra.mxu0 %vm90_vm1, %v88_v3  ;;  %v366_v12 = vpop.eup %365  ;;  %214 = vmatpush.msra.mxu2 %v188_v26 }
  0x15   :  { %347 = vmatmul.msk.f32.vlgmr.msra.gmra.mxu1 %vm118_vm2, %v86_v4  ;;  %v154_v13 = vmul.f32 32.0, %v366_v12  ;;  %vm158_vm4 = vweird.f32 %v366_v12  ;;  %v252_v55 = vld [vmem:[%s613_s11] sm:$0xff]  ;;  %277 = vmatpush.msra.mxu3 %v253_v54 }
  0x16   :  { %v359_v4 = vld [vmem:[#allocation5] ss:$0 sm:$0xff] }
  0x17   :  { %v155_v14 = vsub.f32 1.0, %v154_v13  ;;  %278 = vmatpush.msra.mxu3 %v252_v55 }
  0x19   :  { %v156_v15 = vmul.f32 %v366_v12, %v155_v14 }
  0x1b   :  { %v157_v16 = vadd.f32 %v366_v12, %v156_v15 }
  0x1d   :  { %v159_v17 = vsel %vm158_vm4, %v366_v12, %v157_v16  ;;  %v430_v12 = vmov 16.0  }
  0x91   :  { %v115_v6 = vpop.f32.mrf.mxu0 }
  0x92   :  { %v139_v7 = vpop.f32.mrf.mxu1 }
  0x93   :  { %v140_v8 = vadd.f32 %v139_v7, %v115_v6 }
  0x95   :  { %v146_v9 = vadd.f32 %v354_v5, %v140_v8  ;;  %v360_v8 = vld [vmem:[%s614_s12] ss:$0 sm:$0xff] }
  0x97   :  { %v150_v10 = vsel %vm149_vm3, %v146_v9, 0.0 }
  0x98   :  { %151 = vadd.xlane.f32.xlu0 %v150_v10 }
 0x10b   :  { %v152_v18 = vpop.xlane.xlu0 %151 }
 0x10c   :  { %v160_v19 = vmul.f32 %v159_v17, %v152_v18 }
 0x10e   :  { %v161_v20 = vsub.f32 %v146_v9, %v160_v19 }
 0x110   :  { %v162_v21 = vmul.f32 %v161_v20, %v161_v20 }
 0x112   :  { %v163_v22 = vsel %vm149_vm3, %v162_v21, 0.0 }
 0x113   :  { %164 = vadd.xlane.f32.xlu0 %v163_v22 }
 0x186   :  { %v165_v27 = vpop.xlane.xlu0 %164 }
 0x187   :  { %v166_v28 = vmul.f32 %v165_v27, %v159_v17 }
 0x189   :  { %v167_v29 = vadd.f32 1e-05, %v166_v28 }
 0x18b   :  { %367 = vrsqrt.f32 %v167_v29  ;;  %vm174_vm6 = vweird.f32 %v167_v29 }
 0x191   :  { %v368_v30 = vpop.eup %367 }
 0x192   :  { %v169_v31 = vmul.f32 %v368_v30, %v167_v29  ;;  %vm175_vm5 = vweird.f32 %v368_v30 }
 0x193   :  { %vm176_vm7 = vmor %vm174_vm6, %vm175_vm5 }
 0x194   :  { %v170_v32 = vmul.f32 %v368_v30, %v169_v31 }
 0x196   :  { %v171_v33 = vmul.f32 0.5, %v170_v32 }
 0x198   :  { %v172_v34 = vsub.f32 1.5, %v171_v33  ;;  %v361_v33 = vld [vmem:[%s615_s13] ss:$0 sm:$0xff] }
 0x19a   :  { %v173_v35 = vmul.f32 %v368_v30, %v172_v34 }
 0x19c   :  { %v177_v37 = vsel %vm176_vm7, %v368_v30, %v173_v35 }
 0x19d   :  { %v178_v38 = vmul.f32 %v177_v37, %v161_v20 }
 0x19f   :  { %v182_v40 = vmul.f32 %v355_v36, %v178_v38  ;;  %v362_v36 = vld [vmem:[%s616_s14] ss:$0 sm:$0xff] }
 0x1a1   :  { %v186_v41 = vadd.f32 %v356_v39, %v182_v40  ;;  %v363_v39 = vld [vmem:[%s617_s15] ss:$0 sm:$0xff] }
 0x1a3   :  { %v187_v42 = vmax.f32 %v186_v41, 0.0 }
 0x1a5   :  { %348 = vmatmul.msk.f32.vlgmr.msra.gmra.mxu2 %vm149_vm3, %v187_v42 }
 0x228   :  { %v216_v44 = vpop.f32.mrf.mxu2 }
 0x229   :  { %v217_v45 = vadd.f32 %v357_v43, %v216_v44  ;;  %v364_v43 = vld [vmem:[#allocation2] ss:$0 sm:$0xff] }
 0x22b   :  { %v221_v46 = vsel %vm149_vm3, %v217_v45, 0.0 }
 0x22c   :  { %222 = vadd.xlane.f32.xlu1 %v221_v46 }
 0x29f   :  { %v223_v47 = vpop.xlane.xlu1 %222 }
 0x2a0   :  { %v224_v48 = vmul.f32 %v223_v47, %v159_v17 }
 0x2a2   :  { %v225_v49 = vsub.f32 %v217_v45, %v224_v48 }
 0x2a4   :  { %v226_v50 = vmul.f32 %v225_v49, %v225_v49 }
 0x2a6   :  { %v227_v51 = vsel %vm149_vm3, %v226_v50, 0.0 }
 0x2a7   :  { %228 = vadd.xlane.f32.xlu1 %v227_v51 }
 0x31a   :  { %v229_v56 = vpop.xlane.xlu1 %228 }
 0x31b   :  { %v230_v57 = vmul.f32 %v229_v56, %v159_v17 }
 0x31d   :  { %v231_v58 = vadd.f32 1e-05, %v230_v57 }
 0x31f   :  { %369 = vrsqrt.f32 %v231_v58  ;;  %vm238_vm9 = vweird.f32 %v231_v58 }
 0x320   :  { %371 = vrcp.f32 %v430_v12 }
 0x325   :  { %v370_v59 = vpop.eup %369 }
 0x326   :  { %v233_v60 = vmul.f32 %v370_v59, %v231_v58  ;;  %vm239_vm8 = vweird.f32 %v370_v59  ;;  %v372_v13 = vpop.eup %371 }
 0x327   :  { %vm240_vm10 = vmor %vm238_vm9, %vm239_vm8  ;;  %v290_v14 = vmul.f32 16.0, %v372_v13  ;;  %vm294_vm12 = vweird.f32 %v372_v13 }
 0x328   :  { %v234_v61 = vmul.f32 %v370_v59, %v233_v60 }
 0x329   :  { %v291_v15 = vsub.f32 1.0, %v290_v14 }
 0x32a   :  { %v235_v62 = vmul.f32 0.5, %v234_v61 }
 0x32b   :  { %v292_v16 = vmul.f32 %v372_v13, %v291_v15 }
 0x32c   :  { %v236_v63 = vsub.f32 1.5, %v235_v62 }
 0x32d   :  { %v293_v17 = vadd.f32 %v372_v13, %v292_v16 }
 0x32e   :  { %v237_v0 = vmul.f32 %v370_v59, %v236_v63 }
 0x32f   :  { %v295_v18 = vsel %vm294_vm12, %v372_v13, %v293_v17 }
 0x330   :  { %v241_v2 = vsel %vm240_vm10, %v370_v59, %v237_v0 }
 0x331   :  { %v242_v3 = vmul.f32 %v241_v2, %v225_v49 }
 0x333   :  { %v246_v5 = vmul.f32 %v358_v1, %v242_v3 }
 0x335   :  { %v250_v6 = vadd.f32 %v359_v4, %v246_v5 }
 0x337   :  { %v251_v7 = vmax.f32 %v250_v6, 0.0 }
 0x339   :  { %349 = vmatmul.msk.f32.vlgmr.msra.gmra.mxu3 %vm149_vm3, %v251_v7 }
 0x3bc   :  { %v280_v9 = vpop.f32.mrf.mxu3 }
 0x3bd   :  { %v281_v10 = vadd.f32 %v360_v8, %v280_v9 }
 0x3bf   :  { %v286_v11 = vsel %vm285_vm11, %v281_v10, 0.0 }
 0x3c0   :  { %287 = vadd.xlane.f32.xlu2 %v286_v11 }
 0x433   :  { %v288_v19 = vpop.xlane.xlu2 %287 }
 0x434   :  { %v296_v20 = vmul.f32 %v295_v18, %v288_v19 }
 0x436   :  { %v297_v21 = vsub.f32 %v281_v10, %v296_v20 }
 0x438   :  { %v298_v22 = vmul.f32 %v297_v21, %v297_v21 }
 0x43a   :  { %v299_v23 = vsel %vm285_vm11, %v298_v22, 0.0 }
 0x43b   :  { %300 = vadd.xlane.f32.xlu2 %v299_v23 }
 0x4ae   :  { %v301_v24 = vpop.xlane.xlu2 %300 }
 0x4af   :  { %v302_v25 = vmul.f32 %v301_v24, %v295_v18 }
 0x4b1   :  { %v303_v26 = vadd.f32 1e-05, %v302_v25 }
 0x4b3   :  { %373 = vrsqrt.f32 %v303_v26  ;;  %vm310_vm14 = vweird.f32 %v303_v26 }
 0x4b9   :  { %v374_v27 = vpop.eup %373 }
 0x4ba   :  { %v305_v28 = vmul.f32 %v374_v27, %v303_v26  ;;  %vm311_vm13 = vweird.f32 %v374_v27 }
 0x4bb   :  { %vm312_vm15 = vmor %vm310_vm14, %vm311_vm13 }
 0x4bc   :  { %v306_v29 = vmul.f32 %v374_v27, %v305_v28 }
 0x4be   :  { %v307_v30 = vmul.f32 0.5, %v306_v29 }
 0x4c0   :  { %v308_v31 = vsub.f32 1.5, %v307_v30 }
 0x4c2   :  { %v309_v32 = vmul.f32 %v374_v27, %v308_v31 }
 0x4c4   :  { %v313_v34 = vsel %vm312_vm15, %v374_v27, %v309_v32 }
 0x4c5   :  { %v314_v35 = vmul.f32 %v313_v34, %v297_v21 }
 0x4c7   :  { %v318_v37 = vmul.f32 %v361_v33, %v314_v35 }
 0x4c9   :  { %v322_v38 = vadd.f32 %v362_v36, %v318_v37 }
 0x4cb   :  { %v323_v40 = vmax.f32 %v322_v38, 0.0 }
 0x4cd   :  { %v328_v41 = vmul.f32 %v363_v39, %v323_v40 }
 0x4cf   :  { %v329_v42 = vsel %vm285_vm11, %v328_v41, 0.0 }
 0x4d0   :  { %330 = vadd.xlane.f32.xlu0 %v329_v42 }
 0x543   :  { %v331_v44 = vpop.xlane.xlu0 %330 }
 0x544   :  { %v336_v45 = vadd.f32 %v364_v43, %v331_v44 }
 0x546   :  { %338 = vst.msk [vmem:[%s619_s17] sm:$0xff] %vm337_vm0, %v336_v45 }
 0x547   :  { %343 = vsyncpa [#allocation4], 1 }
 0x548   :  { %344 = vsyncpa [#allocation6], 1 }

</bundles_post_ra>
